<compile_context>
chip_gen: v5e
topology: v5e:2x2
jax: 0.10.0
libtpu: 0.0.40
codegen_flags: <defaults>
</compile_context>

<pallas_src>
import functools
import math

import jax
import jax.numpy as jnp
from jax.experimental import pallas as pl
from jax.experimental.pallas import tpu as pltpu

EPS = 1e-5  # torch.nn.LayerNorm default


def _layer_norm_kernel(x_ref, gamma_ref, beta_ref, o_ref):
    """Row-wise LayerNorm; block last dim == hidden dim."""
    x = x_ref[...].astype(jnp.float32)
    mean = jnp.mean(x, axis=-1, keepdims=True)
    c = x - mean
    var = jnp.mean(c * c, axis=-1, keepdims=True)  # biased variance, like torch
    inv_std = jax.lax.rsqrt(var + EPS)
    out = (c * inv_std) * gamma_ref[...] + beta_ref[...]
    o_ref[...] = out.astype(o_ref.dtype)


def _layer_norm_folded_kernel(x_ref, gamma_ref, beta_ref, seg_ref, segt_ref, o_ref, *, dim):
    """Lane-dense variant: k original rows folded into the lane axis.

    Block is (tm, L) with L = k*dim a multiple of 128. Per-original-row
    reductions/broadcasts run on the (otherwise idle) MXU via a one-hot (L, k)
    segment matrix so loads/stores stay lane-dense full-width vst and the VPU
    only does elementwise work. With k <= 16 the four HIGHEST-precision matmuls
    are a few M MACs per tile and hide under the HBM DMA.
    """
    x = x_ref[...].astype(jnp.float32)   # (tm, L)
    seg = seg_ref[...]                   # (L, k) one-hot, f32
    segt = segt_ref[...]                 # (k, L)
    inv_dim = jnp.float32(1.0 / dim)
    hi = jax.lax.Precision.HIGHEST       # keep ~f32 accuracy (x - mean cancels)

    sums = jnp.dot(x, seg, precision=hi, preferred_element_type=jnp.float32)            # (tm, k)
    mean = sums * inv_dim
    mean_full = jnp.dot(mean, segt, precision=hi, preferred_element_type=jnp.float32)   # (tm, L)
    c = x - mean_full
    sq_sums = jnp.dot(c * c, seg, precision=hi, preferred_element_type=jnp.float32)     # (tm, k)
    var = sq_sums * inv_dim
    inv_std = jax.lax.rsqrt(var + EPS)                                                  # (tm, k)
    inv_std_full = jnp.dot(inv_std, segt, precision=hi,
                           preferred_element_type=jnp.float32)                          # (tm, L)

    out = (c * inv_std_full) * gamma_ref[...] + beta_ref[...]
    o_ref[...] = out.astype(o_ref.dtype)


def _vmem_capacity_bytes():
    try:
        return int(pltpu.get_tpu_info().vmem_capacity_bytes)
    except Exception:
        # Conservative fallback: v7x has only 64 MiB per TensorCore. Never
        # assume more than that if the query fails.
        return 64 * 1024 * 1024


def _padded_vmem_bytes(shape, itemsize):
    """VMEM footprint of an array after (8, 128) sublane/lane padding."""
    if len(shape) == 1:
        shape = (1, shape[0])
    lead = 1
    for s in shape[:-2]:
        lead *= s
    r = -(-shape[-2] // 8) * 8
    c = -(-shape[-1] // 128) * 128
    return lead * r * c * itemsize


def _pick_tile_rows(rows, lane_width, in_itemsize, out_itemsize, resident_bytes, work_budget):
    """Row tile that fits the VMEM budget including in-kernel f32 intermediates."""
    # Per-row VMEM cost:
    #   * double-buffered input + output refs : 2 * lane * (in + out)
    #   * in-kernel f32 intermediates (x_f32, centered, out_f32): ~3 * lane * 4
    per_row = 2 * lane_width * (in_itemsize + out_itemsize) + 3 * lane_width * 4
    budget = max(work_budget - resident_bytes, 1 << 20)
    tm = budget // max(per_row, 1)
    # Byte cap per input block: mem-bound kernels hit ~85-90% of HBM roofline by
    # ~4-8 MiB blocks; bigger only raises VMEM pressure and shrinks the grid.
    tm = min(tm, (8 * 1024 * 1024) // max(lane_width * in_itemsize, 1))
    tm = min(tm, 2048)
    # Grid-depth clamps: >= 2 steps keeps both v7x TensorCores busy (the grid
    # axis is "parallel"); prefer >= 8 steps when blocks can stay >= 512 rows.
    if rows >= 16:
        tm = min(tm, max(8, ((rows // 2) // 8) * 8))
    if rows >= 8 * 512:
        tm = min(tm, max(512, ((rows // 8) // 8) * 8))
    tm = max(8, (tm // 8) * 8)
    if rows <= tm:
        return rows  # single block == full array dim: always legal
    return tm


def _standard_call(x2, gamma, beta, work_budget, compiler_params):
    """LayerNorm on a (rows, dim) slab with the plain row-tiled kernel."""
    rows, dim = x2.shape
    itemsize = jnp.dtype(x2.dtype).itemsize
    gamma2 = gamma.reshape(1, dim).astype(jnp.float32)
    beta2 = beta.reshape(1, dim).astype(jnp.float32)
    resident = 2 * 2 * _padded_vmem_bytes((1, dim), 4)  # gamma + beta, double-buffered
    tm = _pick_tile_rows(rows, dim, itemsize, itemsize, resident, work_budget)
    return pl.pallas_call(
        _layer_norm_kernel,
        out_shape=jax.ShapeDtypeStruct((rows, dim), x2.dtype),
        grid_spec=pltpu.PrefetchScalarGridSpec(
            num_scalar_prefetch=0,
            grid=(pl.cdiv(rows, tm),),
            in_specs=[
                pl.BlockSpec((tm, dim), lambda i: (i, 0)),
                pl.BlockSpec((1, dim), lambda i: (0, 0)),
                pl.BlockSpec((1, dim), lambda i: (0, 0)),
            ],
            out_specs=pl.BlockSpec((tm, dim), lambda i: (i, 0)),
        ),
        compiler_params=compiler_params,
    )(x2, gamma2, beta2)


def _folded_call(xf, gamma, beta, dim, k, work_budget, compiler_params):
    """LayerNorm on a (rows_f, k*dim) slab with k rows folded into the lane axis."""
    rows_f, L = xf.shape
    itemsize = jnp.dtype(xf.dtype).itemsize
    gamma_t = jnp.tile(gamma.reshape(-1).astype(jnp.float32), k).reshape(1, L)
    beta_t = jnp.tile(beta.reshape(-1).astype(jnp.float32), k).reshape(1, L)
    # One-hot segment matrices kept in f32 so the HIGHEST-precision MXU matmuls
    # read them directly (a narrower dtype would just be upcast to an f32 temp
    # in-kernel); their lane/sublane-padded footprint is budgeted below.
    seg = (jnp.arange(L, dtype=jnp.int32)[:, None] // dim
           == jnp.arange(k, dtype=jnp.int32)[None, :]).astype(jnp.float32)  # (L, k)
    segt = seg.T                                                            # (k, L)

    resident = 2 * (_padded_vmem_bytes((L, k), 4)
                    + _padded_vmem_bytes((k, L), 4)
                    + 2 * _padded_vmem_bytes((1, L), 4))
    tm = _pick_tile_rows(rows_f, L, itemsize, itemsize, resident, work_budget)
    return pl.pallas_call(
        functools.partial(_layer_norm_folded_kernel, dim=dim),
        out_shape=jax.ShapeDtypeStruct((rows_f, L), xf.dtype),
        grid_spec=pltpu.PrefetchScalarGridSpec(
            num_scalar_prefetch=0,
            grid=(pl.cdiv(rows_f, tm),),
            in_specs=[
                pl.BlockSpec((tm, L), lambda i: (i, 0)),
                pl.BlockSpec((1, L), lambda i: (0, 0)),
                pl.BlockSpec((1, L), lambda i: (0, 0)),
                pl.BlockSpec((L, k), lambda i: (0, 0)),
                pl.BlockSpec((k, L), lambda i: (0, 0)),
            ],
            out_specs=pl.BlockSpec((tm, L), lambda i: (i, 0)),
        ),
        compiler_params=compiler_params,
    )(xf, gamma_t, beta_t, seg, segt)


def layer_norm(x, gamma, beta):
    """LayerNorm over the last axis of x. x: (..., dim); gamma, beta: (dim,)."""
    orig_shape = x.shape
    dim = orig_shape[-1]
    rows = 1
    for s in orig_shape[:-1]:
        rows *= s
    x2 = x.reshape(rows, dim)

    cap = _vmem_capacity_bytes()
    # Working-set budget for refs + intermediates (~16 MiB on v7x, ~32 MiB on
    # v5e/v6e); scoped VMEM limit kept well under physical capacity
    # (48 MiB on v7x, 64 MiB on v5e/v6e).
    work_budget = cap // 4
    vmem_limit = min((cap * 3) // 4, 64 * 1024 * 1024)
    compiler_params = pltpu.CompilerParams(
        dimension_semantics=("parallel",),   # shards the row axis across v7x's 2 TCs
        vmem_limit_bytes=int(vmem_limit),
    )
    # TODO(synk): sweep pipeline_mode=pl.Buffered(3) on the x BlockSpec for v7x
    # once the kernel is confirmed firmly mem-bound there.

    # Lane-dense path: if dim is not a multiple of 128, fold k rows into the
    # lane axis (k*dim multiple of 128) so stores are unmasked full-width vst.
    k = 1
    if dim % 128 != 0:
        k = 128 // math.gcd(dim, 128)
    L = k * dim
    seg_bytes = _padded_vmem_bytes((L, k), 4) + _padded_vmem_bytes((k, L), 4)
    use_fold = (
        1 < k <= 16                          # small folds capture the lane-dense win
        and rows >= k                        # at least one folded row
        and seg_bytes <= work_budget // 4    # seg/segt stay a small VMEM fraction
    )

    if use_fold:
        rows_main = (rows // k) * k
        out_main = _folded_call(
            x2[:rows_main].reshape(rows_main // k, L),
            gamma, beta, dim, k, work_budget, compiler_params,
        ).reshape(rows_main, dim)
        if rows_main == rows:
            return out_main.reshape(orig_shape)
        # Small remainder (< k rows): lane-sparse standard kernel on just those
        # rows, instead of paying masked stores for the whole array.
        out_rem = _standard_call(x2[rows_main:], gamma, beta, work_budget, compiler_params)
        return jnp.concatenate([out_main, out_rem], axis=0).reshape(orig_shape)

    # dim % 128 == 0 (already lane-dense), or no cheap fold exists.
    # TODO(synk): for large-k dims (e.g. prime hidden sizes) a padded-dim masked
    # variant would recover full-width stores; this path is correct but pays
    # masked vst on the lane tail.
    return _standard_call(x2, gamma, beta, work_budget, compiler_params).reshape(orig_shape)


def _reference_layer_norm(x, gamma, beta):
    mean = jnp.mean(x, axis=-1, keepdims=True)
    var = jnp.mean((x - mean) ** 2, axis=-1, keepdims=True)
    return (x - mean) / jnp.sqrt(var + EPS) * gamma + beta


if __name__ == "__main__":
    key = jax.random.PRNGKey(0)
    kx, kg, kb, kx2, kx3 = jax.random.split(key, 5)

    # Small shape consistent with the module: batch=2, seq=8, hidden=32
    # (hidden=32 exercises the lane-dense folded path, k=4).
    batch, seq, hidden = 2, 8, 32
    x = jax.random.normal(kx, (batch, seq, hidden), dtype=jnp.float32)
    gamma = jnp.ones((hidden,), jnp.float32) + 0.1 * jax.random.normal(kg, (hidden,), jnp.float32)
    beta = 0.1 * jax.random.normal(kb, (hidden,), jnp.float32)

    out = jax.block_until_ready(layer_norm(x, gamma, beta))
    ref = _reference_layer_norm(x, gamma, beta)
    assert jnp.allclose(out, ref, atol=1e-4, rtol=1e-4), "mismatch vs reference (folded path)"

    # dim % 128 == 0: standard lane-dense path.
    hidden2 = 128
    x2 = jax.random.normal(kx2, (batch, seq, hidden2), dtype=jnp.float32)
    gamma2 = jnp.ones((hidden2,), jnp.float32)
    beta2 = jnp.zeros((hidden2,), jnp.float32)
    out2 = jax.block_until_ready(layer_norm(x2, gamma2, beta2))
    ref2 = _reference_layer_norm(x2, gamma2, beta2)
    assert jnp.allclose(out2, ref2, atol=1e-4, rtol=1e-4), "mismatch vs reference (standard path)"

    # rows % k != 0: folded prefix + tiny standard remainder split.
    x3 = jax.random.normal(kx3, (batch, 7, hidden), dtype=jnp.float32)
    out3 = jax.block_until_ready(layer_norm(x3, gamma, beta))
    ref3 = _reference_layer_norm(x3, gamma, beta)
    assert jnp.allclose(out3, ref3, atol=1e-4, rtol=1e-4), "mismatch vs reference (split path)"

    print("KERNEL_OK")
</pallas_src>

<mosaic_0001>
module attributes {stable_mosaic.version = 11 : i64} {
  func.func @_layer_norm_folded_kernel(%arg0: i32, %arg1: memref<4x128xf32, #tpu.memory_space<vmem>>, %arg2: memref<1x128xf32, #tpu.memory_space<vmem>>, %arg3: memref<1x128xf32, #tpu.memory_space<vmem>>, %arg4: memref<128x4xf32, #tpu.memory_space<vmem>>, %arg5: memref<4x128xf32, #tpu.memory_space<vmem>>, %arg6: memref<4x128xf32, #tpu.memory_space<vmem>>) attributes {dimension_semantics = [#tpu.dimension_semantics<parallel>], iteration_bounds = array<i64: 1>, scalar_prefetch = 0 : i64, scratch_operands = 0 : i64, tpu.core_type = #tpu.core_type<tc>, window_params = [{transform_indices = @transform_0, window_bounds = array<i64: 4, 128>}, {pipeline_mode = #tpu.pipeline_mode<synchronous>, transform_indices = @transform_1, window_bounds = array<i64: 1, 128>}, {pipeline_mode = #tpu.pipeline_mode<synchronous>, transform_indices = @transform_2, window_bounds = array<i64: 1, 128>}, {pipeline_mode = #tpu.pipeline_mode<synchronous>, transform_indices = @transform_3, window_bounds = array<i64: 128, 4>}, {pipeline_mode = #tpu.pipeline_mode<synchronous>, transform_indices = @transform_4, window_bounds = array<i64: 4, 128>}, {transform_indices = @transform_5, window_bounds = array<i64: 4, 128>}]} {
    %c0 = arith.constant 0 : index
    %c0_0 = arith.constant 0 : index
    %0 = vector.load %arg1[%c0, %c0_0] : memref<4x128xf32, #tpu.memory_space<vmem>>, vector<4x128xf32>
    %c0_1 = arith.constant 0 : index
    %c0_2 = arith.constant 0 : index
    %1 = vector.load %arg4[%c0_1, %c0_2] : memref<128x4xf32, #tpu.memory_space<vmem>>, vector<128x4xf32>
    %c0_3 = arith.constant 0 : index
    %c0_4 = arith.constant 0 : index
    %2 = vector.load %arg5[%c0_3, %c0_4] : memref<4x128xf32, #tpu.memory_space<vmem>>, vector<4x128xf32>
    %cst = arith.constant dense<0.000000e+00> : vector<4x4xf32>
    %3 = tpu.matmul %0, %1, %cst {dimension_numbers = #tpu.dot_dimension_numbers<[1], [0], [0], [1], [0, 0, 1, 1], [], []>, precision = #tpu.contract_precision<fp32>} : vector<4x128xf32>, vector<128x4xf32>, vector<4x4xf32> -> vector<4x4xf32>
    %cst_5 = arith.constant 3.125000e-02 : f32
    %4 = vector.broadcast %cst_5 : f32 to vector<4x4xf32>
    %5 = arith.mulf %3, %4 : vector<4x4xf32>
    %cst_6 = arith.constant dense<0.000000e+00> : vector<4x128xf32>
    %6 = tpu.matmul %5, %2, %cst_6 {dimension_numbers = #tpu.dot_dimension_numbers<[1], [0], [0], [1], [0, 0, 1, 1], [], []>, precision = #tpu.contract_precision<fp32>} : vector<4x4xf32>, vector<4x128xf32>, vector<4x128xf32> -> vector<4x128xf32>
    %7 = arith.subf %0, %6 : vector<4x128xf32>
    %8 = arith.mulf %7, %7 : vector<4x128xf32>
    %cst_7 = arith.constant dense<0.000000e+00> : vector<4x4xf32>
    %9 = tpu.matmul %8, %1, %cst_7 {dimension_numbers = #tpu.dot_dimension_numbers<[1], [0], [0], [1], [0, 0, 1, 1], [], []>, precision = #tpu.contract_precision<fp32>} : vector<4x128xf32>, vector<128x4xf32>, vector<4x4xf32> -> vector<4x4xf32>
    %cst_8 = arith.constant 3.125000e-02 : f32
    %10 = vector.broadcast %cst_8 : f32 to vector<4x4xf32>
    %11 = arith.mulf %9, %10 : vector<4x4xf32>
    %cst_9 = arith.constant 9.99999974E-6 : f32
    %12 = vector.broadcast %cst_9 : f32 to vector<4x4xf32>
    %13 = arith.addf %11, %12 : vector<4x4xf32>
    %14 = math.rsqrt %13 : vector<4x4xf32>
    %cst_10 = arith.constant dense<0.000000e+00> : vector<4x128xf32>
    %15 = tpu.matmul %14, %2, %cst_10 {dimension_numbers = #tpu.dot_dimension_numbers<[1], [0], [0], [1], [0, 0, 1, 1], [], []>, precision = #tpu.contract_precision<fp32>} : vector<4x4xf32>, vector<4x128xf32>, vector<4x128xf32> -> vector<4x128xf32>
    %16 = arith.mulf %7, %15 : vector<4x128xf32>
    %c0_11 = arith.constant 0 : index
    %c0_12 = arith.constant 0 : index
    %17 = vector.load %arg2[%c0_11, %c0_12] : memref<1x128xf32, #tpu.memory_space<vmem>>, vector<1x128xf32>
    %18 = vector.broadcast %17 : vector<1x128xf32> to vector<4x128xf32>
    %19 = arith.mulf %16, %18 : vector<4x128xf32>
    %c0_13 = arith.constant 0 : index
    %c0_14 = arith.constant 0 : index
    %20 = vector.load %arg3[%c0_13, %c0_14] : memref<1x128xf32, #tpu.memory_space<vmem>>, vector<1x128xf32>
    %21 = vector.broadcast %20 : vector<1x128xf32> to vector<4x128xf32>
    %22 = arith.addf %19, %21 : vector<4x128xf32>
    %c0_15 = arith.constant 0 : index
    %c0_16 = arith.constant 0 : index
    %23 = vector.load %arg6[%c0_15, %c0_16] : memref<4x128xf32, #tpu.memory_space<vmem>>, vector<4x128xf32>
    tpu.vector_store %arg6[%c0_15, %c0_16], %22 {strides = array<i32>} : memref<4x128xf32, #tpu.memory_space<vmem>>, vector<4x128xf32>,
    return
  }
  func.func @transform_0(%arg0: i32) -> (i32, i32) {
    %c0_i32 = arith.constant 0 : i32
    %c0_i32_0 = arith.constant 0 : i32
    return %arg0, %c0_i32 : i32, i32
  }
  func.func @transform_1(%arg0: i32) -> (i32, i32) {
    %c0_i32 = arith.constant 0 : i32
    %c0_i32_0 = arith.constant 0 : i32
    %c0_i32_1 = arith.constant 0 : i32
    return %c0_i32, %c0_i32_0 : i32, i32
  }
  func.func @transform_2(%arg0: i32) -> (i32, i32) {
    %c0_i32 = arith.constant 0 : i32
    %c0_i32_0 = arith.constant 0 : i32
    %c0_i32_1 = arith.constant 0 : i32
    return %c0_i32, %c0_i32_0 : i32, i32
  }
  func.func @transform_3(%arg0: i32) -> (i32, i32) {
    %c0_i32 = arith.constant 0 : i32
    %c0_i32_0 = arith.constant 0 : i32
    %c0_i32_1 = arith.constant 0 : i32
    return %c0_i32, %c0_i32_0 : i32, i32
  }
  func.func @transform_4(%arg0: i32) -> (i32, i32) {
    %c0_i32 = arith.constant 0 : i32
    %c0_i32_0 = arith.constant 0 : i32
    %c0_i32_1 = arith.constant 0 : i32
    return %c0_i32, %c0_i32_0 : i32, i32
  }
  func.func @transform_5(%arg0: i32) -> (i32, i32) {
    %c0_i32 = arith.constant 0 : i32
    %c0_i32_0 = arith.constant 0 : i32
    return %arg0, %c0_i32 : i32, i32
  }
}

</mosaic_0001>

<bundles_post_ra>
// kernel: tpu_custom_call.1
= control target key start
LH: loop header
LB: loop body
LE: loop exit
PB: predicated region body
PF: predicated region fallthrough
CT: control target
= control target key end

     0   :  { %s1614_s0 = inlined_call_operand.vmem [shape: f32[4,128], index: 0, kind: input, shape index: {}]   ;;  %s1615_s1 = inlined_call_operand.vmem [shape: f32[1,128], index: 1, kind: input, shape index: {}]   ;;  %s1616_s2 = inlined_call_operand.vmem [shape: f32[1,128], index: 2, kind: input, shape index: {}]   ;;  %s1617_s3 = inlined_call_operand.vmem [shape: f32[128,4], index: 3, kind: input, shape index: {}]   ;;  %s1618_s4 = inlined_call_operand.vmem [shape: f32[4,128], index: 4, kind: input, shape index: {}]   ;;  %s1619_s5 = inlined_call_operand.hbm [shape: f32[4,128], index: 5, kind: output, shape index: {}]  }
   0x1   :  { %v37_v0 = vld [vmem:[%s1617_s3 + $0x78] sm:$0xff]  ;;  %v36_v1 = vld [vmem:[%s1617_s3 + $0x70] sm:$0xff]  ;;  %v35_v2 = vld [vmem:[%s1617_s3 + $0x68] sm:$0xff] }
   0x2   :  { %v1138_v3 = vand.u32 4294901760, %v37_v0  ;;  %v1140_v4 = vand.u32 4294901760, %v36_v1  ;;  %v1142_v5 = vand.u32 4294901760, %v35_v2  ;;  %v34_v6 = vld [vmem:[%s1617_s3 + $0x60] sm:$0xff]  ;;  %v33_v7 = vld [vmem:[%s1617_s3 + $0x58] sm:$0xff]  ;;  %v32_v8 = vld [vmem:[%s1617_s3 + $0x50] sm:$0xff] }
   0x3   :  { %v1153_v9 = vand.u32 4294901760, %v34_v6  ;;  %v1155_v10 = vand.u32 4294901760, %v33_v7  ;;  %v1157_v11 = vand.u32 4294901760, %v32_v8  ;;  %v31_v12 = vld [vmem:[%s1617_s3 + $0x48] sm:$0xff]  ;;  %v30_v13 = vld [vmem:[%s1617_s3 + $0x40] sm:$0xff]  ;;  %v29_v18 = vld [vmem:[%s1617_s3 + $0x38] sm:$0xff] }
   0x4   :  { %40 = vmatpush.msra.mxu0 %v1138_v3  ;;  %v1167_v14 = vsub.f32 %v37_v0, %v1138_v3  ;;  %v1170_v15 = vsub.f32 %v36_v1, %v1140_v4  ;;  %v1173_v16 = vsub.f32 %v35_v2, %v1142_v5  ;;  %v1175_v17 = vand.u32 4294901760, %v31_v12  ;;  %236 = vmatpush.msra.mxu3 %v1138_v3  ;;  %v28_v26 = vld [vmem:[%s1617_s3 + $0x30] sm:$0xff] }
   0x5   :  { %v1182_v19 = vsub.f32 %v34_v6, %v1153_v9  ;;  %v1185_v20 = vsub.f32 %v33_v7, %v1155_v10  ;;  %v1188_v21 = vsub.f32 %v32_v8, %v1157_v11  ;;  %v1200_v25 = vand.u32 4294901760, %v30_v13 }
   0x6   :  { %42 = vmatpush.msra.mxu0 %v1140_v4  ;;  %v1192_v22 = vand.u32 4294901760, %v1167_v14  ;;  %v1195_v23 = vand.u32 4294901760, %v1170_v15  ;;  %v1198_v24 = vand.u32 4294901760, %v1173_v16  ;;  %183 = vmatpush.msra.mxu2 %v1167_v14  ;;  %v1209_v28 = vand.u32 4294901760, %v29_v18 }
   0x7   :  { %v1207_v27 = vand.u32 4294901760, %v1182_v19  ;;  %v1212_v29 = vsub.f32 %v31_v12, %v1175_v17  ;;  %238 = vmatpush.msra.mxu3 %v1140_v4 }
   0x8   :  { %10 = vsyncpa [#allocation3], 0  ;;  %44 = vmatpush.msra.mxu0 %v1142_v5  ;;  %v83_v30 = vsub.f32 %v1167_v14, %v1192_v22  ;;  %v89_v31 = vsub.f32 %v1170_v15, %v1195_v23  ;;  %v95_v32 = vsub.f32 %v1173_v16, %v1198_v24  ;;  %v1223_v33 = vand.u32 4294901760, %v1185_v20  ;;  %186 = vmatpush.msra.mxu2 %v1170_v15  ;;  %v27_v36 = vld [vmem:[%s1617_s3 + $0x28] sm:$0xff]  ;;  %v26_v42 = vld [vmem:[%s1617_s3 + $0x20] sm:$0xff]  ;;  %s1098_s30 = smov [#allocation2]  }
   0x9   :  { %v1227_v34 = vand.u32 4294901760, %v1188_v21  ;;  %v1229_v35 = vand.u32 4294901760, %v28_v26  ;;  %240 = vmatpush.msra.mxu3 %v1142_v5  ;;  %v101_v39 = vsub.f32 %v1182_v19, %v1207_v27  ;;  %v1243_v40 = vsub.f32 %v30_v13, %v1200_v25  ;;  %v25_v47 = vld [vmem:[%s1617_s3 + $0x18] sm:$0xff]  ;;  %v24_v55 = vld [vmem:[%s1617_s3 + $0x10] sm:$0xff]  ;;  %v23_v60 = vld [vmem:[%s1617_s3 + $0x8] sm:$0xff]  ;;  %s1056_s6 = sshll.u32 %s1098_s30, 4  ;;  %s1057_s6 = int_to_ptr.vmem [resolvable:$true] %s1056_s6 }
   0xa   :  { %v1235_v37 = vand.u32 4294901760, %v83_v30  ;;  %46 = vmatpush.msra.mxu0 %v1153_v9  ;;  %v1238_v38 = vand.u32 4294901760, %v89_v31  ;;  %189 = vmatpush.msra.mxu2 %v1173_v16  ;;  %v1247_v41 = vand.u32 4294901760, %v1212_v29  ;;  %v1255_v43 = vand.u32 4294901760, %v95_v32  ;;  %v22_v1 = vld [vmem:[%s1617_s3] sm:$0xff]  ;;  %s1058_s9 = sshll.u32 %s1619_s5, 4  ;;  %s1059_s9 = int_to_ptr.hbm [resolvable:$true] %s1058_s9 }
   0xb   :  { %242 = vmatpush.msra.mxu3 %v1153_v9  ;;  %v107_v44 = vsub.f32 %v1185_v20, %v1223_v33  ;;  %v1259_v45 = vand.u32 4294901760, %v27_v36  ;;  %v1262_v46 = vsub.f32 %v29_v18, %v1209_v28  ;;  %v113_v48 = vsub.f32 %v1188_v21, %v1227_v34  ;;  %v1334_v7 = vld [vmem:[%s1614_s0] sm:$0xf] }
   0xc   :  { %85 = vmatpush.msra.mxu1 %v1235_v37  ;;  %48 = vmatpush.msra.mxu0 %v1155_v10  ;;  %v1273_v49 = vand.u32 4294901760, %v101_v39  ;;  %v1276_v50 = vand.u32 4294901760, %v1243_v40  ;;  %v1278_v51 = vand.u32 4294901760, %v26_v42  ;;  %v1281_v52 = vsub.f32 %v28_v26, %v1229_v35  ;;  %1631 = vst [vmem:[#allocation8_spill] sm:$0xff] %v1334_v7 }
   0xd   :  { %192 = vmatpush.msra.mxu2 %v1182_v19  ;;  %244 = vmatpush.msra.mxu3 %v1155_v10  ;;  %v119_v53 = vsub.f32 %v1212_v29, %v1247_v41  ;;  %v1285_v54 = vand.u32 4294901760, %v25_v47  ;;  %v1294_v56 = vand.u32 4294901760, %v107_v44  ;;  %v1297_v57 = vand.u32 4294901760, %v1262_v46 }
   0xe   :  { %91 = vmatpush.msra.mxu1 %v1238_v38  ;;  %50 = vmatpush.msra.mxu0 %v1157_v11  ;;  %v1300_v58 = vsub.f32 %v27_v36, %v1259_v45  ;;  %v1302_v59 = vand.u32 4294901760, %v113_v48  ;;  %v125_v61 = vsub.f32 %v1243_v40, %v1276_v50  ;;  %v1314_v62 = vand.u32 4294901760, %v1281_v52 }
   0xf   :  { %195 = vmatpush.msra.mxu2 %v1185_v20  ;;  %246 = vmatpush.msra.mxu3 %v1157_v11  ;;  %1628 = vst [vmem:[#allocation5_spill] sm:$0xff] %v1294_v56  ;;  %v1316_v63 = vand.u32 4294901760, %v24_v55  ;;  %v1319_v0 = vsub.f32 %v26_v42, %v1278_v51  ;;  %v1324_v2 = vand.u32 4294901760, %v119_v53  ;;  %v1327_v6 = vsub.f32 %v25_v47, %v1285_v54 }
  0x10   :  { %97 = vmatpush.msra.mxu1 %v1255_v43  ;;  %52 = vmatpush.msra.mxu0 %v1175_v17  ;;  %1629 = vst [vmem:[#allocation6_spill] sm:$0xff] %v1302_v59  ;;  %v131_v8 = vsub.f32 %v1262_v46, %v1297_v57  ;;  %v1341_v12 = vand.u32 4294901760, %v1300_v58  ;;  %v1343_v13 = vand.u32 4294901760, %v23_v60  ;;  %v1346_v18 = vand.u32 4294901760, %v1334_v7 }
  0x11   :  { %198 = vmatpush.msra.mxu2 %v1188_v21  ;;  %248 = vmatpush.msra.mxu3 %v1175_v17  ;;  %1630 = vst [vmem:[#allocation7_spill] sm:$0xff] %v1324_v2  ;;  %v1348_v26 = vand.u32 4294901760, %v22_v1  ;;  %v1354_v30 = vand.u32 4294901760, %v125_v61  ;;  %v137_v31 = vsub.f32 %v1281_v52, %v1314_v62  ;;  %v1359_v32 = vand.u32 4294901760, %v1319_v0 }
  0x12   :  { %103 = vmatpush.msra.mxu1 %v1273_v49  ;;  %54 = vmatpush.msra.mxu0 %v1200_v25  ;;  %v1362_v36 = vsub.f32 %v24_v55, %v1316_v63  ;;  %v1365_v39 = vand.u32 4294901760, %v1327_v6  ;;  %v1371_v42 = vand.u32 4294901760, %v131_v8  ;;  %v143_v44 = vsub.f32 %v1300_v58, %v1341_v12 }
  0x13   :  { %201 = vmatpush.msra.mxu2 %v1212_v29  ;;  %250 = vmatpush.msra.mxu3 %v1200_v25  ;;  %1632 = vst [vmem:[#allocation9_spill] sm:$0xff] %v1354_v30  ;;  %v1376_v47 = vsub.f32 %v23_v60, %v1343_v13  ;;  %v72_v48 = vsub.f32 %v1334_v7, %v1346_v18  ;;  %v1384_v53 = vand.u32 4294901760, %v137_v31  ;;  %vm385_vm0 = vcmask 1043456  }
  0x14   :  { %109 = vmatpush.msra.mxu1 %v1294_v56  ;;  %56 = vmatpush.msra.mxu0 %v1209_v28  ;;  %1633 = vst [vmem:[#allocation10_spill] sm:$0xff] %v1371_v42  ;;  %v149_v55 = vsub.f32 %v1319_v0, %v1359_v32  ;;  %v1389_v61 = vand.u32 4294901760, %v1362_v36  ;;  %v1392_v60 = vsub.f32 %v22_v1, %v1348_v26  ;;  %v1398_v8 = vand.u32 4294901760, %v143_v44 }
  0x15   :  { %204 = vmatpush.msra.mxu2 %v1243_v40  ;;  %252 = vmatpush.msra.mxu3 %v1209_v28  ;;  %1634 = vst [vmem:[#allocation11_spill] sm:$0xff] %v1384_v53  ;;  %v155_v31 = vsub.f32 %v1327_v6, %v1365_v39  ;;  %v1403_v7 = vand.u32 4294901760, %v1376_v47  ;;  %vm381_vm1 = vcmask 31744  }
  0x16   :  { %115 = vmatpush.msra.mxu1 %v1302_v59  ;;  %58 = vmatpush.msra.mxu0 %v1229_v35  ;;  %1635 = vst [vmem:[#allocation12_spill] sm:$0xff] %v1398_v8  ;;  %v1409_v1 = vand.u32 4294901760, %v149_v55  ;;  %v161_v44 = vsub.f32 %v1362_v36, %v1389_v61 }
  0x17   :  { %207 = vmatpush.msra.mxu2 %v1262_v46  ;;  %254 = vmatpush.msra.mxu3 %v1229_v35  ;;  %v167_v55 = vsub.f32 %v1376_v47, %v1403_v7 }
  0x18   :  { %121 = vmatpush.msra.mxu1 %v1324_v2  ;;  %60 = vmatpush.msra.mxu0 %v1259_v45  ;;  %v1420_v2 = vand.u32 4294901760, %v155_v31  ;;  %v1428_v59 = vand.u32 4294901760, %v161_v44 }
  0x19   :  { %210 = vmatpush.msra.mxu2 %v1281_v52  ;;  %256 = vmatpush.msra.mxu3 %v1259_v45  ;;  %v1435_v31 = vand.u32 4294901760, %v167_v55 }
  0x1a   :  { %127 = vmatpush.msra.mxu1 %v1354_v30  ;;  %62 = vmatpush.msra.mxu0 %v1278_v51  ;;  %v73_v30 = vand.u32 4294901760, %v72_v48 }
  0x1b   :  { %213 = vmatpush.msra.mxu2 %v1300_v58  ;;  %258 = vmatpush.msra.mxu3 %v1278_v51 }
  0x1c   :  { %133 = vmatpush.msra.mxu1 %v1371_v42  ;;  %64 = vmatpush.msra.mxu0 %v1285_v54  ;;  %v1414_v42 = vand.u32 4294901760, %v1392_v60 }
  0x1d   :  { %216 = vmatpush.msra.mxu2 %v1319_v0  ;;  %260 = vmatpush.msra.mxu3 %v1285_v54 }
  0x1e   :  { %139 = vmatpush.msra.mxu1 %v1384_v53  ;;  %66 = vmatpush.msra.mxu0 %v1316_v63  ;;  %v74_v53 = vsub.f32 %v72_v48, %v73_v30 }
  0x1f   :  { %219 = vmatpush.msra.mxu2 %v1327_v6  ;;  %262 = vmatpush.msra.mxu3 %v1316_v63 }
  0x20   :  { %145 = vmatpush.msra.mxu1 %v1398_v8  ;;  %68 = vmatpush.msra.mxu0 %v1343_v13  ;;  %v173_v8 = vsub.f32 %v1392_v60, %v1414_v42  ;;  %v75_v56 = vand.u32 4294901760, %v74_v53 }
  0x21   :  { %222 = vmatpush.msra.mxu2 %v1362_v36  ;;  %264 = vmatpush.msra.mxu3 %v1343_v13 }
  0x22   :  { %151 = vmatpush.msra.mxu1 %v1409_v1  ;;  %70 = vmatpush.msra.mxu0 %v1348_v26  ;;  %v1441_v44 = vand.u32 4294901760, %v173_v8 }
  0x23   :  { %225 = vmatpush.msra.mxu2 %v1376_v47  ;;  %266 = vmatpush.msra.mxu3 %v1348_v26 }
  0x24   :  { %277 = vmatpush.msrb.mxu0 %v1192_v22  ;;  %157 = vmatpush.msra.mxu1 %v1420_v2 }
  0x25   :  { %228 = vmatpush.msra.mxu2 %v1392_v60  ;;  %270 = vmatmul.f32.vlgmr.msra.gmra.mxu3 %v73_v30 }
  0x26   :  { %281 = vmatpush.msrb.mxu0 %v1195_v23  ;;  %163 = vmatpush.msra.mxu1 %v1428_v59 }
  0x27   :  { %231 = vmatmul.f32.vlgmr.msra.gmra.mxu2 %v72_v48  ;;  %76 = vmatmul.f32.vlgmr.msra.gmra.mxu0 %v75_v56 }
  0x28   :  { %285 = vmatpush.msrb.mxu0 %v1198_v24  ;;  %169 = vmatpush.msra.mxu1 %v1435_v31 }
  0x2a   :  { %289 = vmatpush.msrb.mxu0 %v1207_v27  ;;  %175 = vmatpush.msra.mxu1 %v1441_v44 }
  0x2b   :  { %177 = vmatmul.f32.vlgmr.msra.gmra.mxu1 %v1346_v18 }
  0x2c   :  { %344 = vmatpush.msrb.mxu1 %v1138_v3  ;;  %293 = vmatpush.msrb.mxu0 %v1223_v33 }
  0x2e   :  { %346 = vmatpush.msrb.mxu1 %v1140_v4  ;;  %297 = vmatpush.msrb.mxu0 %v1227_v34 }
  0x30   :  { %348 = vmatpush.msrb.mxu1 %v1142_v5  ;;  %301 = vmatpush.msrb.mxu0 %v1247_v41 }
  0x32   :  { %350 = vmatpush.msrb.mxu1 %v1153_v9  ;;  %305 = vmatpush.msrb.mxu0 %v1276_v50 }
  0x34   :  { %352 = vmatpush.msrb.mxu1 %v1155_v10  ;;  %309 = vmatpush.msrb.mxu0 %v1297_v57 }
  0x36   :  { %354 = vmatpush.msrb.mxu1 %v1157_v11  ;;  %313 = vmatpush.msrb.mxu0 %v1314_v62 }
  0x38   :  { %356 = vmatpush.msrb.mxu1 %v1175_v17  ;;  %317 = vmatpush.msrb.mxu0 %v1341_v12 }
  0x3a   :  { %358 = vmatpush.msrb.mxu1 %v1200_v25  ;;  %321 = vmatpush.msrb.mxu0 %v1359_v32 }
  0x3c   :  { %360 = vmatpush.msrb.mxu1 %v1209_v28  ;;  %325 = vmatpush.msrb.mxu0 %v1365_v39 }
  0x3e   :  { %362 = vmatpush.msrb.mxu1 %v1229_v35  ;;  %329 = vmatpush.msrb.mxu0 %v1389_v61 }
  0x40   :  { %364 = vmatpush.msrb.mxu1 %v1259_v45  ;;  %333 = vmatpush.msrb.mxu0 %v1403_v7 }
  0x42   :  { %366 = vmatpush.msrb.mxu1 %v1278_v51  ;;  %337 = vmatpush.msrb.mxu0 %v1414_v42 }
  0x43   :  { %339 = vmatmul.f32.vlgmr.msrb.gmra.mxu0 %v1346_v18 }
  0x44   :  { %368 = vmatpush.msrb.mxu1 %v1285_v54  ;;  %681 = vmatpush.msra.mxu0 %v1167_v14  ;;  %v38_v14 = vld [vmem:[%s1618_s4] sm:$0xf] }
  0x46   :  { %370 = vmatpush.msrb.mxu1 %v1316_v63  ;;  %684 = vmatpush.msra.mxu0 %v1170_v15  ;;  %v387_v15 = vsel %vm385_vm0, %v38_v14, 0 }
  0x48   :  { %372 = vmatpush.msrb.mxu1 %v1343_v13  ;;  %687 = vmatpush.msra.mxu0 %v1173_v16  ;;  %v1513_v16 = vand.u32 4294901760, %v387_v15 }
  0x4a   :  { %374 = vmatpush.msrb.mxu1 %v1348_v26  ;;  %690 = vmatpush.msra.mxu0 %v1182_v19  ;;  %v1516_v19 = vsub.f32 %v387_v15, %v1513_v16 }
  0x4b   :  { %376 = vmatmul.f32.vlgmr.msrb.gmra.mxu1 %v1346_v18  ;;  %405 = vmatpush.msrb.mxu2 %v1513_v16 }
  0x4c   :  { %734 = vmatpush.msra.mxu1 %v1138_v3  ;;  %693 = vmatpush.msra.mxu0 %v1185_v20  ;;  %v1521_v20 = vand.u32 4294901760, %v1516_v19 }
  0x4d   :  { %458 = vmatpush.msra.mxu2 %v1516_v19 }
  0x4e   :  { %736 = vmatpush.msra.mxu1 %v1140_v4  ;;  %696 = vmatpush.msra.mxu0 %v1188_v21  ;;  %v433_v21 = vsub.f32 %v1516_v19, %v1521_v20 }
  0x50   :  { %738 = vmatpush.msra.mxu1 %v1142_v5  ;;  %699 = vmatpush.msra.mxu0 %v1212_v29  ;;  %v434_v29 = vand.u32 4294901760, %v433_v21  ;;  %v1636_v21 = vld [vmem:[#allocation5_spill] sm:$0xff] }
  0x52   :  { %740 = vmatpush.msra.mxu1 %v1153_v9  ;;  %702 = vmatpush.msra.mxu0 %v1243_v40 }
  0x53   :  { %435 = vmatpush.msrb.mxu3 %v434_v29 }
  0x54   :  { %742 = vmatpush.msra.mxu1 %v1155_v10  ;;  %705 = vmatpush.msra.mxu0 %v1262_v46 }
  0x55   :  { %481 = vmatpush.msra.mxu3 %v1513_v16 }
  0x56   :  { %744 = vmatpush.msra.mxu1 %v1157_v11  ;;  %708 = vmatpush.msra.mxu0 %v1281_v52 }
  0x58   :  { %746 = vmatpush.msra.mxu1 %v1175_v17  ;;  %711 = vmatpush.msra.mxu0 %v1300_v58 }
  0x5a   :  { %748 = vmatpush.msra.mxu1 %v1200_v25  ;;  %714 = vmatpush.msra.mxu0 %v1319_v0 }
  0x5c   :  { %750 = vmatpush.msra.mxu1 %v1209_v28  ;;  %717 = vmatpush.msra.mxu0 %v1327_v6 }
  0x5e   :  { %752 = vmatpush.msra.mxu1 %v1229_v35  ;;  %720 = vmatpush.msra.mxu0 %v1362_v36 }
  0x60   :  { %754 = vmatpush.msra.mxu1 %v1259_v45  ;;  %723 = vmatpush.msra.mxu0 %v1376_v47 }
  0x62   :  { %756 = vmatpush.msra.mxu1 %v1278_v51  ;;  %726 = vmatpush.msra.mxu0 %v1392_v60 }
  0x64   :  { %758 = vmatpush.msra.mxu1 %v1285_v54  ;;  %909 = vmatpush.msrb.mxu0 %v1513_v16 }
  0x66   :  { %760 = vmatpush.msra.mxu1 %v1316_v63 }
  0x68   :  { %762 = vmatpush.msra.mxu1 %v1343_v13 }
  0x6a   :  { %764 = vmatpush.msra.mxu1 %v1348_v26 }
  0x6c   :  { %939 = vmatpush.msrb.mxu1 %v434_v29  ;;  %v1637_v29 = vld [vmem:[#allocation6_spill] sm:$0xff] }
  0xa4   :  { %v77_v46 = vpop.f32.mrf.mxu0 }
  0xa8   :  { %v178_v40 = vpop.f32.mrf.mxu1  ;;  %v271_v0 = vpop.f32.mrf.mxu3 }
  0xa9   :  { %v179_v52 = vadd.f32 %v178_v40, %v77_v46  ;;  %v1638_v40 = vld [vmem:[#allocation7_spill] sm:$0xff] }
  0xaa   :  { %v232_v56 = vpop.f32.mrf.mxu2 }
  0xab   :  { %v233_v58 = vadd.f32 %v232_v56, %v179_v52 }
  0xad   :  { %v272_v6 = vadd.f32 %v271_v0, %v233_v58 }
  0xc0   :  { %v340_v18 = vpop.f32.mrf.mxu0 }
  0xc1   :  { %v341_v30 = vadd.f32 %v340_v18, %v272_v6 }
  0xc8   :  { %v377_v36 = vpop.f32.mrf.mxu1 }
  0xc9   :  { %v378_v47 = vadd.f32 %v377_v36, %v341_v30 }
  0xcb   :  { %v380_v48 = vmul.f32 0.03125, %v378_v47 }
  0xcd   :  { %v383_v53 = vsel %vm381_vm1, %v380_v48, 0 }
  0xce   :  { %v406_v60 = vand.u32 4294901760, %v383_v53 }
  0xd0   :  { %v407_v8 = vsub.f32 %v383_v53, %v406_v60  ;;  %437 = vmatmul.f32.vlgmr.msrb.gmra.mxu3 %v406_v60 }
  0xd1   :  { %529 = vmatpush.msrb.mxu3 %v1513_v16 }
  0xd2   :  { %v408_v55 = vand.u32 4294901760, %v407_v8 }
  0xd4   :  { %v409_v14 = vsub.f32 %v407_v8, %v408_v55 }
  0xd6   :  { %v410_v15 = vand.u32 4294901760, %v409_v14 }
  0xd8   :  { %411 = vmatmul.f32.vlgmr.msrb.gmra.mxu2 %v410_v15  ;;  %485 = vmatmul.f32.vlgmr.msra.gmra.mxu3 %v408_v55 }
  0xd9   :  { %507 = vmatpush.msrb.mxu2 %v1521_v20  ;;  %583 = vmatpush.msra.mxu3 %v1235_v37  ;;  %v1639_v37 = vld [vmem:[#allocation9_spill] sm:$0xff] }
  0xdb   :  { %589 = vmatpush.msra.mxu3 %v1238_v38  ;;  %v1640_v38 = vld [vmem:[#allocation10_spill] sm:$0xff] }
  0xdd   :  { %595 = vmatpush.msra.mxu3 %v1255_v43  ;;  %v1641_v43 = vld [vmem:[#allocation11_spill] sm:$0xff] }
  0xdf   :  { %601 = vmatpush.msra.mxu3 %v1273_v49  ;;  %v1642_v49 = vld [vmem:[#allocation12_spill] sm:$0xff] }
  0xe0   :  { %461 = vmatmul.f32.vlgmr.msra.gmra.mxu2 %v407_v8  ;;  %531 = vmatmul.f32.vlgmr.msrb.gmra.mxu3 %v406_v60 }
  0xe1   :  { %538 = vmatpush.msra.mxu2 %v1138_v3  ;;  %607 = vmatpush.msra.mxu3 %v1636_v21  ;;  %v1068_v21 = vld [vmem:[%s1615_s1] ss:$0 sm:$0xff] }
  0xe3   :  { %540 = vmatpush.msra.mxu2 %v1140_v4  ;;  %613 = vmatpush.msra.mxu3 %v1637_v29  ;;  %v1069_v29 = vld [vmem:[%s1616_s2] ss:$0 sm:$0xff] }
  0xe5   :  { %542 = vmatpush.msra.mxu2 %v1142_v5  ;;  %619 = vmatpush.msra.mxu3 %v1638_v40 }
  0xe7   :  { %544 = vmatpush.msra.mxu2 %v1153_v9  ;;  %625 = vmatpush.msra.mxu3 %v1639_v37 }
  0xe8   :  { %509 = vmatmul.f32.vlgmr.msrb.gmra.mxu2 %v406_v60 }
  0xe9   :  { %546 = vmatpush.msra.mxu2 %v1155_v10  ;;  %631 = vmatpush.msra.mxu3 %v1640_v38 }
  0xeb   :  { %548 = vmatpush.msra.mxu2 %v1157_v11  ;;  %637 = vmatpush.msra.mxu3 %v1641_v43 }
  0xed   :  { %550 = vmatpush.msra.mxu2 %v1175_v17  ;;  %643 = vmatpush.msra.mxu3 %v1642_v49 }
  0xef   :  { %552 = vmatpush.msra.mxu2 %v1200_v25  ;;  %649 = vmatpush.msra.mxu3 %v1409_v1 }
  0xf1   :  { %554 = vmatpush.msra.mxu2 %v1209_v28  ;;  %655 = vmatpush.msra.mxu3 %v1420_v2 }
  0xf3   :  { %556 = vmatpush.msra.mxu2 %v1229_v35  ;;  %661 = vmatpush.msra.mxu3 %v1428_v59 }
  0xf5   :  { %558 = vmatpush.msra.mxu2 %v1259_v45  ;;  %667 = vmatpush.msra.mxu3 %v1435_v31 }
  0xf7   :  { %560 = vmatpush.msra.mxu2 %v1278_v51  ;;  %673 = vmatpush.msra.mxu3 %v1441_v44 }
  0xf9   :  { %842 = vmatpush.msrb.mxu3 %v1138_v3  ;;  %562 = vmatpush.msra.mxu2 %v1285_v54 }
  0xfb   :  { %844 = vmatpush.msrb.mxu3 %v1140_v4  ;;  %564 = vmatpush.msra.mxu2 %v1316_v63 }
  0xfd   :  { %846 = vmatpush.msrb.mxu3 %v1142_v5  ;;  %566 = vmatpush.msra.mxu2 %v1343_v13 }
  0xff   :  { %848 = vmatpush.msrb.mxu3 %v1153_v9  ;;  %568 = vmatpush.msra.mxu2 %v1348_v26 }
 0x101   :  { %775 = vmatpush.msrb.mxu2 %v1192_v22  ;;  %850 = vmatpush.msrb.mxu3 %v1155_v10 }
 0x103   :  { %779 = vmatpush.msrb.mxu2 %v1195_v23  ;;  %852 = vmatpush.msrb.mxu3 %v1157_v11 }
 0x105   :  { %783 = vmatpush.msrb.mxu2 %v1198_v24  ;;  %854 = vmatpush.msrb.mxu3 %v1175_v17 }
 0x107   :  { %787 = vmatpush.msrb.mxu2 %v1207_v27  ;;  %856 = vmatpush.msrb.mxu3 %v1200_v25  ;;  %v1643_v27 = vld [vmem:[#allocation8_spill] sm:$0xff] }
 0x109   :  { %791 = vmatpush.msrb.mxu2 %v1223_v33  ;;  %858 = vmatpush.msrb.mxu3 %v1209_v28 }
 0x10b   :  { %795 = vmatpush.msrb.mxu2 %v1227_v34  ;;  %860 = vmatpush.msrb.mxu3 %v1229_v35 }
 0x10d   :  { %799 = vmatpush.msrb.mxu2 %v1247_v41  ;;  %862 = vmatpush.msrb.mxu3 %v1259_v45 }
 0x10f   :  { %803 = vmatpush.msrb.mxu2 %v1276_v50  ;;  %864 = vmatpush.msrb.mxu3 %v1278_v51 }
 0x111   :  { %807 = vmatpush.msrb.mxu2 %v1297_v57  ;;  %866 = vmatpush.msrb.mxu3 %v1285_v54 }
 0x113   :  { %811 = vmatpush.msrb.mxu2 %v1314_v62  ;;  %868 = vmatpush.msrb.mxu3 %v1316_v63 }
 0x115   :  { %815 = vmatpush.msrb.mxu2 %v1341_v12  ;;  %870 = vmatpush.msrb.mxu3 %v1343_v13 }
 0x117   :  { %819 = vmatpush.msrb.mxu2 %v1359_v32  ;;  %872 = vmatpush.msrb.mxu3 %v1348_v26 }
 0x119   :  { %823 = vmatpush.msrb.mxu2 %v1365_v39 }
 0x11b   :  { %827 = vmatpush.msrb.mxu2 %v1389_v61 }
 0x11d   :  { %831 = vmatpush.msrb.mxu2 %v1403_v7 }
 0x11f   :  { %835 = vmatpush.msrb.mxu2 %v1414_v42 }
 0x153   :  { %v438_v3 = vpop.f32.mrf.mxu3 }
 0x15b   :  { %v412_v4 = vpop.f32.mrf.mxu2  ;;  %v486_v5 = vpop.f32.mrf.mxu3 }
 0x15c   :  { %v439_v10 = vadd.f32 %v438_v3, %v412_v4 }
 0x163   :  { %v462_v9 = vpop.f32.mrf.mxu2  ;;  %v532_v24 = vpop.f32.mrf.mxu3 }
 0x164   :  { %v463_v11 = vadd.f32 %v462_v9, %v439_v10 }
 0x166   :  { %v487_v17 = vadd.f32 %v486_v5, %v463_v11 }
 0x16b   :  { %v510_v22 = vpop.f32.mrf.mxu2 }
 0x16c   :  { %v511_v23 = vadd.f32 %v510_v22, %v487_v17 }
 0x16e   :  { %v533_v25 = vadd.f32 %v532_v24, %v511_v23 }
 0x170   :  { %v1595_v28 = vsub.f32 %v1643_v27, %v533_v25 }
 0x172   :  { %v536_v33 = vmul.f32 %v1595_v28, %v1595_v28 }
 0x174   :  { %v569_v34 = vand.u32 4294901760, %v536_v33 }
 0x176   :  { %675 = vmatmul.f32.vlgmr.msra.gmra.mxu3 %v569_v34  ;;  %v570_v35 = vsub.f32 %v536_v33, %v569_v34 }
 0x178   :  { %729 = vmatmul.f32.vlgmr.msra.gmra.mxu0 %v570_v35  ;;  %v571_v41 = vand.u32 4294901760, %v570_v35 }
 0x179   :  { %962 = vmatpush.msra.mxu0 %v1516_v19 }
 0x17a   :  { %768 = vmatmul.f32.vlgmr.msra.gmra.mxu1 %v571_v41  ;;  %v572_v45 = vsub.f32 %v570_v35, %v571_v41 }
 0x17b   :  { %985 = vmatpush.msra.mxu1 %v1513_v16 }
 0x17c   :  { %v573_v50 = vand.u32 4294901760, %v572_v45 }
 0x17e   :  { %574 = vmatmul.f32.vlgmr.msra.gmra.mxu2 %v573_v50  ;;  %874 = vmatmul.f32.vlgmr.msrb.gmra.mxu3 %v569_v34 }
 0x186   :  { %837 = vmatmul.f32.vlgmr.msrb.gmra.mxu2 %v569_v34 }
 0x1f5   :  { %v730_v59 = vpop.f32.mrf.mxu0 }
 0x1f7   :  { %v769_v63 = vpop.f32.mrf.mxu1 }
 0x1f9   :  { %v676_v51 = vpop.f32.mrf.mxu3 }
 0x201   :  { %v575_v54 = vpop.f32.mrf.mxu2  ;;  %v875_v13 = vpop.f32.mrf.mxu3 }
 0x202   :  { %v677_v57 = vadd.f32 %v676_v51, %v575_v54 }
 0x204   :  { %v731_v62 = vadd.f32 %v730_v59, %v677_v57 }
 0x206   :  { %v770_v2 = vadd.f32 %v769_v63, %v731_v62 }
 0x209   :  { %v838_v7 = vpop.f32.mrf.mxu2 }
 0x20a   :  { %v839_v12 = vadd.f32 %v838_v7, %v770_v2 }
 0x20c   :  { %v876_v26 = vadd.f32 %v875_v13, %v839_v12 }
 0x20e   :  { %v878_v32 = vmul.f32 0.03125, %v876_v26 }
 0x210   :  { %v879_v39 = vadd.f32 1e-05, %v878_v32 }
 0x212   :  { %1070 = vrsqrt.f32 %v879_v39  ;;  %vm886_vm3 = vweird.f32 %v879_v39 }
 0x218   :  { %v1071_v42 = vpop.eup %1070 }
 0x219   :  { %v881_v61 = vmul.f32 %v1071_v42, %v879_v39  ;;  %vm887_vm2 = vweird.f32 %v1071_v42 }
 0x21a   :  { %vm888_vm4 = vmor %vm886_vm3, %vm887_vm2 }
 0x21b   :  { %v882_v1 = vmul.f32 %v1071_v42, %v881_v61 }
 0x21d   :  { %v883_v31 = vmul.f32 0.5, %v882_v1 }
 0x21f   :  { %v884_v44 = vsub.f32 1.5, %v883_v31 }
 0x221   :  { %v885_v19 = vmul.f32 %v1071_v42, %v884_v44 }
 0x223   :  { %v889_v46 = vsel %vm888_vm4, %v1071_v42, %v885_v19 }
 0x224   :  { %v891_v52 = vsel %vm381_vm1, %v889_v46, 0 }
 0x225   :  { %v910_v56 = vand.u32 4294901760, %v891_v52 }
 0x227   :  { %v911_v58 = vsub.f32 %v891_v52, %v910_v56  ;;  %941 = vmatmul.f32.vlgmr.msrb.gmra.mxu1 %v910_v56 }
 0x228   :  { %1033 = vmatpush.msrb.mxu1 %v1513_v16 }
 0x229   :  { %v912_v0 = vand.u32 4294901760, %v911_v58 }
 0x22b   :  { %v913_v6 = vsub.f32 %v911_v58, %v912_v0 }
 0x22d   :  { %v914_v18 = vand.u32 4294901760, %v913_v6 }
 0x22f   :  { %915 = vmatmul.f32.vlgmr.msrb.gmra.mxu0 %v914_v18  ;;  %989 = vmatmul.f32.vlgmr.msra.gmra.mxu1 %v912_v0 }
 0x230   :  { %1011 = vmatpush.msrb.mxu0 %v1521_v20 }
 0x237   :  { %965 = vmatmul.f32.vlgmr.msra.gmra.mxu0 %v911_v58  ;;  %1035 = vmatmul.f32.vlgmr.msrb.gmra.mxu1 %v910_v56 }
 0x23f   :  { %1013 = vmatmul.f32.vlgmr.msrb.gmra.mxu0 %v910_v56 }
 0x2a4   :  { %v942_v30 = vpop.f32.mrf.mxu1 }
 0x2ac   :  { %v916_v36 = vpop.f32.mrf.mxu0  ;;  %v990_v47 = vpop.f32.mrf.mxu1 }
 0x2ad   :  { %v943_v53 = vadd.f32 %v942_v30, %v916_v36 }
 0x2b4   :  { %v966_v48 = vpop.f32.mrf.mxu0  ;;  %v1036_v16 = vpop.f32.mrf.mxu1 }
 0x2b5   :  { %v967_v60 = vadd.f32 %v966_v48, %v943_v53 }
 0x2b7   :  { %v991_v8 = vadd.f32 %v990_v47, %v967_v60 }
 0x2bc   :  { %v1014_v55 = vpop.f32.mrf.mxu0 }
 0x2bd   :  { %v1015_v14 = vadd.f32 %v1014_v55, %v991_v8 }
 0x2bf   :  { %v1037_v15 = vadd.f32 %v1036_v16, %v1015_v14 }
 0x2c1   :  { %v1039_v20 = vmul.f32 %v1037_v15, %v1595_v28 }
 0x2c3   :  { %v1044_v40 = vmul.f32 %v1068_v21, %v1039_v20 }
 0x2c5   :  { %v1049_v37 = vadd.f32 %v1069_v29, %v1044_v40 }
 0x2c7   :  { %1050 = vst [vmem:[#allocation2] sm:$0xf] %v1049_v37 }
 0x2c8   :  { %1061 = dma.vmem_to_hbm [thread:$0]  %s1057_s6, 64, %s1059_s9, [#allocation3]  }
 0x2c9   :  { %1096 = dma.done.wait [#allocation3], 64  }
 0x2ca   :  { %1097 = vsyncadd [#allocation3], 4294967232 }
 0x2cb   :  { %1066 = vsyncpa [#allocation3], 1 }

</bundles_post_ra>
